<compile_context>
chip_gen: v7x
topology: tpu7x:2x2x1
jax: 0.10.0
libtpu: 0.0.40
codegen_flags: <defaults>
</compile_context>

<pallas_src>
import jax
import jax.numpy as jnp
from jax.experimental import pallas as pl
from jax.experimental.pallas import tpu as pltpu


def linear_kernel(x_ref, wb_ref, o_ref):
    """y = x @ W^T + b for one batch block.

    x_ref:  (tb, IN)      activations
    wb_ref: (IN+1, OUT)   rows 0..IN-1 = W^T, row IN = bias
    o_ref:  (tb, OUT)     raw logits (no softmax: matches nn.Linear forward)
    """
    in_dim = wb_ref.shape[0] - 1
    x = x_ref[...]                      # (tb, IN)
    wb = wb_ref[...]                    # (IN+1, OUT) — single packed param load
    w_t = wb[:in_dim, :]                # (IN, OUT)
    b = wb[in_dim:, :]                  # (1, OUT)
    # Native (M,K)x(K,N) MXU form; f32 accumulation.
    # (For K=4/N=3 a 4-step VPU accumulate would also work; kept on the MXU for
    #  a guaranteed clean lowering.)
    y = jnp.dot(x, w_t, preferred_element_type=jnp.float32)
    o_ref[...] = (y + b).astype(o_ref.dtype)


def softmax_classifier_forward(x, weight, bias, *, tile_b=512):
    """x: (B, IN) f32, weight: (OUT, IN), bias: (OUT,) -> (B, OUT) logits."""
    B, IN = x.shape
    OUT = weight.shape[0]

    # Pack W^T and bias into one buffer -> a single parameter DMA.
    wb = jnp.concatenate([weight.T, bias.reshape(1, OUT)], axis=0)  # (IN+1, OUT)

    flops = 2 * B * IN * OUT
    bytes_accessed = 4 * (x.size + wb.size + B * OUT)
    cost = pl.CostEstimate(
        flops=flops, transcendentals=0, bytes_accessed=bytes_accessed)

    if B >= tile_b and B % tile_b == 0:
        # Large-batch path: tile over B only; weight+bias block stays resident.
        grid = (B // tile_b,)
        return pl.pallas_call(
            linear_kernel,
            out_shape=jax.ShapeDtypeStruct((B, OUT), x.dtype),
            grid=grid,
            in_specs=[
                pl.BlockSpec((tile_b, IN), lambda i: (i, 0)),
                pl.BlockSpec((IN + 1, OUT), lambda i: (0, 0)),
            ],
            out_specs=pl.BlockSpec((tile_b, OUT), lambda i: (i, 0)),
            compiler_params=pltpu.CompilerParams(
                dimension_semantics=("parallel",)),
            cost_estimate=cost,
        )(x, wb)

    # Small-batch path: gridless, whole arrays in VMEM, no pipelining scaffolding.
    return pl.pallas_call(
        linear_kernel,
        out_shape=jax.ShapeDtypeStruct((B, OUT), x.dtype),
        in_specs=[
            pl.BlockSpec(memory_space=pltpu.MemorySpace.VMEM),
            pl.BlockSpec(memory_space=pltpu.MemorySpace.VMEM),
        ],
        out_specs=pl.BlockSpec(memory_space=pltpu.MemorySpace.VMEM),
        cost_estimate=cost,
    )(x, wb)


if __name__ == "__main__":
    key = jax.random.PRNGKey(0)
    k_x, k_w, k_b, k_x2 = jax.random.split(key, 4)

    B, IN, OUT = 8, 4, 3  # nn.Linear(4, 3); small batch of 8

    weight = jax.random.normal(k_w, (OUT, IN), dtype=jnp.float32) * 0.1
    bias = jax.random.normal(k_b, (OUT,), dtype=jnp.float32) * 0.1
    x = jax.random.normal(k_x, (B, IN), dtype=jnp.float32)

    # Small-batch (gridless) path.
    out = softmax_classifier_forward(x, weight, bias)
    out = jax.block_until_ready(out)
    ref = x @ weight.T + bias
    assert out.shape == (B, OUT)
    assert jnp.allclose(out, ref, atol=1e-5, rtol=1e-5)

    # Large-batch (tiled, batch-parallel) path.
    B_big = 1024
    x_big = jax.random.normal(k_x2, (B_big, IN), dtype=jnp.float32)
    out_big = softmax_classifier_forward(x_big, weight, bias)
    out_big = jax.block_until_ready(out_big)
    ref_big = x_big @ weight.T + bias
    assert out_big.shape == (B_big, OUT)
    assert jnp.allclose(out_big, ref_big, atol=1e-5, rtol=1e-5)

    print("KERNEL_OK")
</pallas_src>

<mosaic_0001>
module attributes {stable_mosaic.version = 11 : i64} {
  func.func @linear_kernel(%arg0: memref<8x4xf32, #tpu.memory_space<vmem>>, %arg1: memref<5x3xf32, #tpu.memory_space<vmem>>, %arg2: memref<8x3xf32, #tpu.memory_space<vmem>>) attributes {dimension_semantics = [], scalar_prefetch = 0 : i64, scratch_operands = 0 : i64, tpu.core_type = #tpu.core_type<tc>} {
    %c0 = arith.constant 0 : index
    %c0_0 = arith.constant 0 : index
    %0 = vector.load %arg0[%c0, %c0_0] : memref<8x4xf32, #tpu.memory_space<vmem>>, vector<8x4xf32>
    %c0_1 = arith.constant 0 : index
    %c0_2 = arith.constant 0 : index
    %1 = vector.load %arg1[%c0_1, %c0_2] : memref<5x3xf32, #tpu.memory_space<vmem>>, vector<5x3xf32>
    %2 = vector.extract_strided_slice %1 {offsets = [0, 0], sizes = [4, 3], strides = [1, 1]} : vector<5x3xf32> to vector<4x3xf32>
    %3 = vector.extract_strided_slice %1 {offsets = [4, 0], sizes = [1, 3], strides = [1, 1]} : vector<5x3xf32> to vector<1x3xf32>
    %cst = arith.constant dense<0.000000e+00> : vector<8x3xf32>
    %4 = tpu.matmul %0, %2, %cst {dimension_numbers = #tpu.dot_dimension_numbers<[1], [0], [0], [1], [0, 0, 1, 1], [], []>} : vector<8x4xf32>, vector<4x3xf32>, vector<8x3xf32> -> vector<8x3xf32>
    %5 = vector.broadcast %3 : vector<1x3xf32> to vector<8x3xf32>
    %6 = arith.addf %4, %5 : vector<8x3xf32>
    %c0_3 = arith.constant 0 : index
    %c0_4 = arith.constant 0 : index
    %7 = vector.load %arg2[%c0_3, %c0_4] : memref<8x3xf32, #tpu.memory_space<vmem>>, vector<8x3xf32>
    tpu.vector_store %arg2[%c0_3, %c0_4], %6 {strides = array<i32>} : memref<8x3xf32, #tpu.memory_space<vmem>>, vector<8x3xf32>,
    return
  }
}

</mosaic_0001>

<bundles_post_ra>
// kernel: tpu_custom_call.1
= control target key start
LH: loop header
LB: loop body
LE: loop exit
PB: predicated region body
PF: predicated region fallthrough
CT: control target
= control target key end

     0   :  { %vm21_vm0 = vcmask 1043456   ;;  %vm17_vm1 = vcmask 31744   ;;  %v112_v0 = vmov 0.0   ;;  %vm113_vm2 = vmmov 0   ;;  %s138_s1 = inlined_call_operand.vmem [shape: f32[5,3], index: 1, kind: input, shape index: {}]   ;;  %s139_s0 = inlined_call_operand.vmem [shape: f32[8,4], index: 0, kind: input, shape index: {}]   ;;  %s140_s2 = inlined_call_operand.vmem [shape: f32[8,3], index: 2, kind: output, shape index: {}]  }
   0x1   :  { %105 = vmatprep.subr.mxu0 %v112_v0  ;;  %v12_v1 = vld [vmem:[%s138_s1] sm:$0x1f]  ;;  %107 = vmatprep.mubr.msk.f32.mxu0 %vm113_vm2, %v112_v0  ;;  %v13_v3 = vlaneseq  ;;  %vm95_vm3 = vcmask 23552  }
   0x2   :  { %v11_v2 = vld [vmem:[%s139_s0] sm:$0xff]  ;;  %106 = vmatpush3.msk.msra.mxu0 %vm21_vm0, %v12_v1 }
   0x3   :  { %108 = vmatmul.mubr.msk.f32.vlgmr.msra.gmra.mrb[0].mxu0 %vm17_vm1, %v11_v2  ;;  %v14_v4 = vshrl.u32 %v13_v3, 7 }
   0x5   :  { %v15_v5 = vsub.s32 4, %v14_v4 }
   0x7   :  { %v16_v6 = vrot.slane %v12_v1, %v15_v5 }
  0xd6   :  { %v91_v7 = vpop.f32.mrb[0].mxu0 }
  0xd7   :  { %v92_v8 = vadd.f32 %v91_v7, %v16_v6  ;;  %v109_v9 = vpop.f32.mrb[1].mxu0 }
  0xd9   :  { %96 = vst.msk [vmem:[%s140_s2] sm:$0xff] %vm95_vm3, %v92_v8 }

</bundles_post_ra>
